<compile_context>
chip_gen: v6e
topology: v6e:2x2x1
jax: 0.10.0
libtpu: 0.0.40
codegen_flags: <defaults>
</compile_context>

<pallas_src>
import jax
import jax.numpy as jnp
from jax.experimental import pallas as pl
from jax.experimental.pallas import tpu as pltpu

IN_DIM = 28 * 28          # 784
HIDDEN_DIM = 64
HID_PAD = 128             # hidden dim zero-padded to lane width (exact)
MAX_TB = 512              # cross-generation safe batch tile
SPLIT_THRESHOLD = 256     # above this batch, force grid >= 2 (v7x: 2 TCs)


def _autoencoder_kernel(x_ref, w_enc_ref, b_enc_ref, w_dec_ref, b_dec_ref, out_ref):
    # Two MXU matmuls with f32 accumulation; whole tile resident in VMEM.
    x = x_ref[...]                                                       # (tb, 784)
    enc = jnp.dot(x, w_enc_ref[...],
                  preferred_element_type=jnp.float32) + b_enc_ref[...]   # (tb, 128)
    dec = jnp.dot(enc, w_dec_ref[...],
                  preferred_element_type=jnp.float32) + b_dec_ref[...]   # (tb, 784)
    out_ref[...] = dec.astype(out_ref.dtype)


def prepare_params(w_enc, b_enc, w_dec, b_dec):
    """One-time prep: zero-pad the hidden dim 64 -> 128 (numerically exact).

    w_enc: (784, 64), b_enc: (64,), w_dec: (64, 784), b_dec: (784,)
    (weights stored as (in, out), i.e. PyTorch weight transposed).
    """
    w_enc_p = jnp.pad(w_enc.astype(jnp.float32),
                      ((0, 0), (0, HID_PAD - HIDDEN_DIM)))
    b_enc_p = jnp.pad(b_enc.astype(jnp.float32),
                      (0, HID_PAD - HIDDEN_DIM)).reshape(1, HID_PAD)
    w_dec_p = jnp.pad(w_dec.astype(jnp.float32),
                      ((0, HID_PAD - HIDDEN_DIM), (0, 0)))
    b_dec_p = b_dec.astype(jnp.float32).reshape(1, IN_DIM)
    return w_enc_p, b_enc_p, w_dec_p, b_dec_p


def _pick_tiling(batch):
    """Choose (num_tiles, tb) so padded rows per tile are < 8 and tb <= MAX_TB."""
    num_tiles = pl.cdiv(batch, MAX_TB)
    if batch > SPLIT_THRESHOLD:
        num_tiles = max(num_tiles, 2)      # keep both TCs busy on v7x
    tb = pl.cdiv(pl.cdiv(batch, num_tiles), 8) * 8
    return num_tiles, tb


def linear_autoencoder_forward(x, w_enc_p, b_enc_p, w_dec_p, b_dec_p):
    """x: any shape whose trailing dims flatten to 784 (e.g. (B, 1, 28, 28)).

    Params must come from prepare_params(). Returns decoded: (B, 784) f32.
    """
    x2d = x.reshape(-1, IN_DIM).astype(jnp.float32)
    batch = x2d.shape[0]
    num_tiles, tb = _pick_tiling(batch)
    padded_b = num_tiles * tb

    # Only pad/slice when the batch is not already a tile multiple.
    x_in = x2d if padded_b == batch else jnp.pad(
        x2d, ((0, padded_b - batch), (0, 0)))

    flops = 4 * padded_b * IN_DIM * HID_PAD          # two (M,784)x(784/128,..) matmuls
    bytes_accessed = (2 * padded_b * IN_DIM * 4      # x read + out write
                      + 2 * IN_DIM * HID_PAD * 4     # both weights
                      + (IN_DIM + HID_PAD) * 4)      # biases

    out = pl.pallas_call(
        _autoencoder_kernel,
        out_shape=jax.ShapeDtypeStruct((padded_b, IN_DIM), jnp.float32),
        grid=(num_tiles,),
        in_specs=[
            pl.BlockSpec((tb, IN_DIM), lambda i: (i, 0)),        # x: slides over batch
            pl.BlockSpec((IN_DIM, HID_PAD), lambda i: (0, 0)),   # w_enc: VMEM-resident
            pl.BlockSpec((1, HID_PAD), lambda i: (0, 0)),        # b_enc
            pl.BlockSpec((HID_PAD, IN_DIM), lambda i: (0, 0)),   # w_dec
            pl.BlockSpec((1, IN_DIM), lambda i: (0, 0)),         # b_dec
        ],
        out_specs=pl.BlockSpec((tb, IN_DIM), lambda i: (i, 0)),
        compiler_params=pltpu.CompilerParams(
            dimension_semantics=("parallel",)),                  # shard batch tiles
        cost_estimate=pl.CostEstimate(flops=flops, transcendentals=0,
                                      bytes_accessed=bytes_accessed),
    )(x_in, w_enc_p, b_enc_p, w_dec_p, b_dec_p)

    return out if padded_b == batch else out[:batch]


def init_params(key):
    """Deterministic init mimicking nn.Linear's uniform(-1/sqrt(fan_in), +)."""
    k1, k2, k3, k4 = jax.random.split(key, 4)
    bound_enc = 1.0 / jnp.sqrt(IN_DIM)
    bound_dec = 1.0 / jnp.sqrt(HIDDEN_DIM)
    # Stored as (in, out) — i.e. PyTorch weight transposed.
    w_enc = jax.random.uniform(k1, (IN_DIM, HIDDEN_DIM), jnp.float32,
                               -bound_enc, bound_enc)
    b_enc = jax.random.uniform(k2, (HIDDEN_DIM,), jnp.float32,
                               -bound_enc, bound_enc)
    w_dec = jax.random.uniform(k3, (HIDDEN_DIM, IN_DIM), jnp.float32,
                               -bound_dec, bound_dec)
    b_dec = jax.random.uniform(k4, (IN_DIM,), jnp.float32,
                               -bound_dec, bound_dec)
    return w_enc, b_enc, w_dec, b_dec


if __name__ == "__main__":
    key = jax.random.PRNGKey(0)
    k_params, k_x1, k_x2 = jax.random.split(key, 3)

    w_enc, b_enc, w_dec, b_dec = init_params(k_params)
    params_p = prepare_params(w_enc, b_enc, w_dec, b_dec)

    def reference(x):
        x2d = x.reshape(-1, IN_DIM)
        return (x2d @ w_enc + b_enc) @ w_dec + b_dec

    # Case 1: small MNIST-like batch -> single grid step, tb=8.
    x_small = jax.random.normal(k_x1, (2, 1, 28, 28), jnp.float32)
    dec_small = jax.block_until_ready(
        linear_autoencoder_forward(x_small, *params_p))
    assert dec_small.shape == (2, IN_DIM)
    assert jnp.allclose(dec_small, reference(x_small), atol=2e-2, rtol=2e-2)

    # Case 2: non-tile-multiple batch > SPLIT_THRESHOLD -> grid=2, tb=152,
    # only 4 padded rows (exercises tight tiling + remainder handling).
    x_big = jax.random.normal(k_x2, (300, 1, 28, 28), jnp.float32)
    dec_big = jax.block_until_ready(
        linear_autoencoder_forward(x_big, *params_p))
    assert dec_big.shape == (300, IN_DIM)
    assert jnp.allclose(dec_big, reference(x_big), atol=2e-2, rtol=2e-2)

    print("KERNEL_OK")
</pallas_src>

<mosaic_0001>
module attributes {stable_mosaic.version = 11 : i64} {
  func.func @_autoencoder_kernel(%arg0: i32, %arg1: memref<8x784xf32, #tpu.memory_space<vmem>>, %arg2: memref<784x128xf32, #tpu.memory_space<vmem>>, %arg3: memref<1x128xf32, #tpu.memory_space<vmem>>, %arg4: memref<128x784xf32, #tpu.memory_space<vmem>>, %arg5: memref<1x784xf32, #tpu.memory_space<vmem>>, %arg6: memref<8x784xf32, #tpu.memory_space<vmem>>) attributes {dimension_semantics = [#tpu.dimension_semantics<parallel>], iteration_bounds = array<i64: 1>, scalar_prefetch = 0 : i64, scratch_operands = 0 : i64, tpu.core_type = #tpu.core_type<tc>, window_params = [{transform_indices = @transform_0, window_bounds = array<i64: 8, 784>}, {pipeline_mode = #tpu.pipeline_mode<synchronous>, transform_indices = @transform_1, window_bounds = array<i64: 784, 128>}, {pipeline_mode = #tpu.pipeline_mode<synchronous>, transform_indices = @transform_2, window_bounds = array<i64: 1, 128>}, {pipeline_mode = #tpu.pipeline_mode<synchronous>, transform_indices = @transform_3, window_bounds = array<i64: 128, 784>}, {pipeline_mode = #tpu.pipeline_mode<synchronous>, transform_indices = @transform_4, window_bounds = array<i64: 1, 784>}, {transform_indices = @transform_5, window_bounds = array<i64: 8, 784>}]} {
    %c0 = arith.constant 0 : index
    %c0_0 = arith.constant 0 : index
    %0 = vector.load %arg1[%c0, %c0_0] : memref<8x784xf32, #tpu.memory_space<vmem>>, vector<8x784xf32>
    %c0_1 = arith.constant 0 : index
    %c0_2 = arith.constant 0 : index
    %1 = vector.load %arg2[%c0_1, %c0_2] : memref<784x128xf32, #tpu.memory_space<vmem>>, vector<784x128xf32>
    %cst = arith.constant dense<0.000000e+00> : vector<8x128xf32>
    %2 = tpu.matmul %0, %1, %cst {dimension_numbers = #tpu.dot_dimension_numbers<[1], [0], [0], [1], [0, 0, 1, 1], [], []>} : vector<8x784xf32>, vector<784x128xf32>, vector<8x128xf32> -> vector<8x128xf32>
    %c0_3 = arith.constant 0 : index
    %c0_4 = arith.constant 0 : index
    %3 = vector.load %arg3[%c0_3, %c0_4] : memref<1x128xf32, #tpu.memory_space<vmem>>, vector<1x128xf32>
    %4 = vector.broadcast %3 : vector<1x128xf32> to vector<8x128xf32>
    %5 = arith.addf %2, %4 : vector<8x128xf32>
    %c0_5 = arith.constant 0 : index
    %c0_6 = arith.constant 0 : index
    %6 = vector.load %arg4[%c0_5, %c0_6] : memref<128x784xf32, #tpu.memory_space<vmem>>, vector<128x784xf32>
    %cst_7 = arith.constant dense<0.000000e+00> : vector<8x784xf32>
    %7 = tpu.matmul %5, %6, %cst_7 {dimension_numbers = #tpu.dot_dimension_numbers<[1], [0], [0], [1], [0, 0, 1, 1], [], []>} : vector<8x128xf32>, vector<128x784xf32>, vector<8x784xf32> -> vector<8x784xf32>
    %c0_8 = arith.constant 0 : index
    %c0_9 = arith.constant 0 : index
    %8 = vector.load %arg5[%c0_8, %c0_9] : memref<1x784xf32, #tpu.memory_space<vmem>>, vector<1x784xf32>
    %9 = vector.broadcast %8 : vector<1x784xf32> to vector<8x784xf32>
    %10 = arith.addf %7, %9 : vector<8x784xf32>
    %c0_10 = arith.constant 0 : index
    %c0_11 = arith.constant 0 : index
    %11 = vector.load %arg6[%c0_10, %c0_11] : memref<8x784xf32, #tpu.memory_space<vmem>>, vector<8x784xf32>
    tpu.vector_store %arg6[%c0_10, %c0_11], %10 {strides = array<i32>} : memref<8x784xf32, #tpu.memory_space<vmem>>, vector<8x784xf32>,
    return
  }
  func.func @transform_0(%arg0: i32) -> (i32, i32) {
    %c0_i32 = arith.constant 0 : i32
    %c0_i32_0 = arith.constant 0 : i32
    return %arg0, %c0_i32 : i32, i32
  }
  func.func @transform_1(%arg0: i32) -> (i32, i32) {
    %c0_i32 = arith.constant 0 : i32
    %c0_i32_0 = arith.constant 0 : i32
    %c0_i32_1 = arith.constant 0 : i32
    return %c0_i32, %c0_i32_0 : i32, i32
  }
  func.func @transform_2(%arg0: i32) -> (i32, i32) {
    %c0_i32 = arith.constant 0 : i32
    %c0_i32_0 = arith.constant 0 : i32
    %c0_i32_1 = arith.constant 0 : i32
    return %c0_i32, %c0_i32_0 : i32, i32
  }
  func.func @transform_3(%arg0: i32) -> (i32, i32) {
    %c0_i32 = arith.constant 0 : i32
    %c0_i32_0 = arith.constant 0 : i32
    %c0_i32_1 = arith.constant 0 : i32
    return %c0_i32, %c0_i32_0 : i32, i32
  }
  func.func @transform_4(%arg0: i32) -> (i32, i32) {
    %c0_i32 = arith.constant 0 : i32
    %c0_i32_0 = arith.constant 0 : i32
    %c0_i32_1 = arith.constant 0 : i32
    return %c0_i32, %c0_i32_0 : i32, i32
  }
  func.func @transform_5(%arg0: i32) -> (i32, i32) {
    %c0_i32 = arith.constant 0 : i32
    %c0_i32_0 = arith.constant 0 : i32
    return %arg0, %c0_i32 : i32, i32
  }
}

</mosaic_0001>

<bundles_post_ra>
// kernel: tpu_custom_call.1
= control target key start
LH: loop header
LB: loop body
LE: loop exit
PB: predicated region body
PF: predicated region fallthrough
CT: control target
= control target key end

     0   :  { %s1790_s0 = inlined_call_operand.vmem [shape: f32[8,784], index: 0, kind: input, shape index: {}]   ;;  %s1791_s1 = inlined_call_operand.vmem [shape: f32[784,128], index: 1, kind: input, shape index: {}]   ;;  %s1792_s2 = inlined_call_operand.vmem [shape: f32[1,128], index: 2, kind: input, shape index: {}]   ;;  %s1793_s3 = inlined_call_operand.vmem [shape: f32[128,784], index: 3, kind: input, shape index: {}]   ;;  %s1794_s4 = inlined_call_operand.vmem [shape: f32[1,784], index: 4, kind: input, shape index: {}]   ;;  %s1795_s5 = inlined_call_operand.hbm [shape: f32[8,784], index: 5, kind: output, shape index: {}]  }
   0x1   :  { %v59_v0 = vld [vmem:[%s1791_s1 + $0xf8] sm:$0xff]  ;;  %v58_v2 = vld [vmem:[%s1791_s1 + $0xf0] sm:$0xff]  ;;  %v57_v6 = vld [vmem:[%s1791_s1 + $0xe8] sm:$0xff] }
   0x2   :  { %v43_v1 = vld [vmem:[%s1791_s1 + $0x78] sm:$0xff]  ;;  %872 = vmatprep.subr.mxu0 %v59_v0  ;;  %v42_v4 = vld [vmem:[%s1791_s1 + $0x70] sm:$0xff]  ;;  %v41_v8 = vld [vmem:[%s1791_s1 + $0x68] sm:$0xff] }
   0x3   :  { %v91_v3 = vld [vmem:[%s1791_s1 + $0x1f8] sm:$0xff]  ;;  %873 = vmatpush3.msra.mxu0 %v43_v1  ;;  %v90_v7 = vld [vmem:[%s1791_s1 + $0x1f0] sm:$0xff]  ;;  %v89_v10 = vld [vmem:[%s1791_s1 + $0x1e8] sm:$0xff] }
   0x4   :  { %v75_v5 = vld [vmem:[%s1791_s1 + $0x178] sm:$0xff]  ;;  %907 = vmatprep.subr.mxu1 %v91_v3  ;;  %874 = vmatprep.subr.mxu0 %v58_v2  ;;  %v74_v9 = vld [vmem:[%s1791_s1 + $0x170] sm:$0xff]  ;;  %v56_v11 = vld [vmem:[%s1791_s1 + $0xe0] sm:$0xff] }
   0x5   :  { %908 = vmatpush3.msra.mxu1 %v75_v5  ;;  %875 = vmatpush3.msra.mxu0 %v42_v4  ;;  %v73_v12 = vld [vmem:[%s1791_s1 + $0x168] sm:$0xff]  ;;  %v40_v13 = vld [vmem:[%s1791_s1 + $0x60] sm:$0xff]  ;;  %v55_v15 = vld [vmem:[%s1791_s1 + $0xd8] sm:$0xff] }
   0x6   :  { %909 = vmatprep.subr.mxu1 %v90_v7  ;;  %876 = vmatprep.subr.mxu0 %v57_v6  ;;  %v88_v14 = vld [vmem:[%s1791_s1 + $0x1e0] sm:$0xff]  ;;  %v39_v17 = vld [vmem:[%s1791_s1 + $0x58] sm:$0xff]  ;;  %v54_v19 = vld [vmem:[%s1791_s1 + $0xd0] sm:$0xff] }
   0x7   :  { %910 = vmatpush3.msra.mxu1 %v74_v9  ;;  %877 = vmatpush3.msra.mxu0 %v41_v8  ;;  %v72_v16 = vld [vmem:[%s1791_s1 + $0x160] sm:$0xff]  ;;  %v87_v18 = vld [vmem:[%s1791_s1 + $0x1d8] sm:$0xff]  ;;  %v38_v21 = vld [vmem:[%s1791_s1 + $0x50] sm:$0xff] }
   0x8   :  { %911 = vmatprep.subr.mxu1 %v89_v10  ;;  %878 = vmatprep.subr.mxu0 %v56_v11  ;;  %v71_v20 = vld [vmem:[%s1791_s1 + $0x158] sm:$0xff]  ;;  %v86_v22 = vld [vmem:[%s1791_s1 + $0x1d0] sm:$0xff]  ;;  %v53_v23 = vld [vmem:[%s1791_s1 + $0xc8] sm:$0xff] }
   0x9   :  { %912 = vmatpush3.msra.mxu1 %v73_v12  ;;  %879 = vmatpush3.msra.mxu0 %v40_v13  ;;  %v70_v24 = vld [vmem:[%s1791_s1 + $0x150] sm:$0xff]  ;;  %v37_v25 = vld [vmem:[%s1791_s1 + $0x48] sm:$0xff]  ;;  %v52_v27 = vld [vmem:[%s1791_s1 + $0xc0] sm:$0xff] }
   0xa   :  { %913 = vmatprep.subr.mxu1 %v88_v14  ;;  %880 = vmatprep.subr.mxu0 %v55_v15  ;;  %v85_v26 = vld [vmem:[%s1791_s1 + $0x1c8] sm:$0xff]  ;;  %v36_v29 = vld [vmem:[%s1791_s1 + $0x40] sm:$0xff]  ;;  %v51_v31 = vld [vmem:[%s1791_s1 + $0xb8] sm:$0xff] }
   0xb   :  { %914 = vmatpush3.msra.mxu1 %v72_v16  ;;  %881 = vmatpush3.msra.mxu0 %v39_v17  ;;  %v69_v28 = vld [vmem:[%s1791_s1 + $0x148] sm:$0xff]  ;;  %v84_v30 = vld [vmem:[%s1791_s1 + $0x1c0] sm:$0xff]  ;;  %v35_v33 = vld [vmem:[%s1791_s1 + $0x38] sm:$0xff] }
   0xc   :  { %915 = vmatprep.subr.mxu1 %v87_v18  ;;  %882 = vmatprep.subr.mxu0 %v54_v19  ;;  %v68_v32 = vld [vmem:[%s1791_s1 + $0x140] sm:$0xff]  ;;  %v83_v34 = vld [vmem:[%s1791_s1 + $0x1b8] sm:$0xff]  ;;  %v50_v35 = vld [vmem:[%s1791_s1 + $0xb0] sm:$0xff] }
   0xd   :  { %916 = vmatpush3.msra.mxu1 %v71_v20  ;;  %883 = vmatpush3.msra.mxu0 %v38_v21  ;;  %v67_v36 = vld [vmem:[%s1791_s1 + $0x138] sm:$0xff]  ;;  %v34_v37 = vld [vmem:[%s1791_s1 + $0x30] sm:$0xff]  ;;  %v49_v39 = vld [vmem:[%s1791_s1 + $0xa8] sm:$0xff] }
   0xe   :  { %917 = vmatprep.subr.mxu1 %v86_v22  ;;  %884 = vmatprep.subr.mxu0 %v53_v23  ;;  %v82_v38 = vld [vmem:[%s1791_s1 + $0x1b0] sm:$0xff]  ;;  %v33_v41 = vld [vmem:[%s1791_s1 + $0x28] sm:$0xff]  ;;  %v48_v43 = vld [vmem:[%s1791_s1 + $0xa0] sm:$0xff] }
   0xf   :  { %918 = vmatpush3.msra.mxu1 %v70_v24  ;;  %885 = vmatpush3.msra.mxu0 %v37_v25  ;;  %v66_v40 = vld [vmem:[%s1791_s1 + $0x130] sm:$0xff]  ;;  %v81_v42 = vld [vmem:[%s1791_s1 + $0x1a8] sm:$0xff]  ;;  %v32_v45 = vld [vmem:[%s1791_s1 + $0x20] sm:$0xff] }
  0x10   :  { %919 = vmatprep.subr.mxu1 %v85_v26  ;;  %886 = vmatprep.subr.mxu0 %v52_v27  ;;  %v65_v44 = vld [vmem:[%s1791_s1 + $0x128] sm:$0xff]  ;;  %v80_v46 = vld [vmem:[%s1791_s1 + $0x1a0] sm:$0xff]  ;;  %v47_v47 = vld [vmem:[%s1791_s1 + $0x98] sm:$0xff] }
  0x11   :  { %920 = vmatpush3.msra.mxu1 %v69_v28  ;;  %887 = vmatpush3.msra.mxu0 %v36_v29  ;;  %v64_v48 = vld [vmem:[%s1791_s1 + $0x120] sm:$0xff]  ;;  %v31_v49 = vld [vmem:[%s1791_s1 + $0x18] sm:$0xff]  ;;  %v46_v51 = vld [vmem:[%s1791_s1 + $0x90] sm:$0xff] }
  0x12   :  { %921 = vmatprep.subr.mxu1 %v84_v30  ;;  %888 = vmatprep.subr.mxu0 %v51_v31  ;;  %v79_v50 = vld [vmem:[%s1791_s1 + $0x198] sm:$0xff]  ;;  %v30_v53 = vld [vmem:[%s1791_s1 + $0x10] sm:$0xff]  ;;  %v45_v55 = vld [vmem:[%s1791_s1 + $0x88] sm:$0xff] }
  0x13   :  { %922 = vmatpush3.msra.mxu1 %v68_v32  ;;  %889 = vmatpush3.msra.mxu0 %v35_v33  ;;  %v63_v52 = vld [vmem:[%s1791_s1 + $0x118] sm:$0xff]  ;;  %v78_v54 = vld [vmem:[%s1791_s1 + $0x190] sm:$0xff]  ;;  %v29_v57 = vld [vmem:[%s1791_s1 + $0x8] sm:$0xff] }
  0x14   :  { %923 = vmatprep.subr.mxu1 %v83_v34  ;;  %890 = vmatprep.subr.mxu0 %v50_v35  ;;  %v62_v56 = vld [vmem:[%s1791_s1 + $0x110] sm:$0xff]  ;;  %v77_v58 = vld [vmem:[%s1791_s1 + $0x188] sm:$0xff]  ;;  %v44_v59 = vld [vmem:[%s1791_s1 + $0x80] sm:$0xff] }
  0x15   :  { %924 = vmatpush3.msra.mxu1 %v67_v36  ;;  %891 = vmatpush3.msra.mxu0 %v34_v37  ;;  %v22_v60 = vld [vmem:[%s1790_s0 + $0x8] sm:$0xff]  ;;  %v28_v61 = vld [vmem:[%s1791_s1] sm:$0xff]  ;;  %v123_v1 = vld [vmem:[%s1791_s1 + $0x2f8] sm:$0xff] }
  0x16   :  { %925 = vmatprep.subr.mxu1 %v82_v38  ;;  %892 = vmatprep.subr.mxu0 %v49_v39  ;;  %v61_v62 = vld [vmem:[%s1791_s1 + $0x108] sm:$0xff]  ;;  %v21_v63 = vld [vmem:[%s1790_s0] sm:$0xff]  ;;  %v24_v3 = vld [vmem:[%s1790_s0 + $0x18] sm:$0xff] }
  0x17   :  { %926 = vmatpush3.msra.mxu1 %v66_v40  ;;  %893 = vmatpush3.msra.mxu0 %v33_v41  ;;  %v76_v0 = vld [vmem:[%s1791_s1 + $0x180] sm:$0xff]  ;;  %v107_v4 = vld [vmem:[%s1791_s1 + $0x278] sm:$0xff]  ;;  %v23_v5 = vld [vmem:[%s1790_s0 + $0x10] sm:$0xff] }
  0x18   :  { %927 = vmatprep.subr.mxu1 %v81_v42  ;;  %894 = vmatprep.subr.mxu0 %v48_v43  ;;  %v60_v2 = vld [vmem:[%s1791_s1 + $0x100] sm:$0xff]  ;;  %v122_v6 = vld [vmem:[%s1791_s1 + $0x2f0] sm:$0xff]  ;;  %v26_v8 = vld [vmem:[%s1790_s0 + $0x28] sm:$0xff] }
  0x19   :  { %928 = vmatpush3.msra.mxu1 %v65_v44  ;;  %895 = vmatpush3.msra.mxu0 %v32_v45  ;;  %v106_v7 = vld [vmem:[%s1791_s1 + $0x270] sm:$0xff]  ;;  %v121_v9 = vld [vmem:[%s1791_s1 + $0x2e8] sm:$0xff] }
  0x1a   :  { %929 = vmatprep.subr.mxu1 %v80_v46  ;;  %896 = vmatprep.subr.mxu0 %v47_v47 }
  0x1b   :  { %930 = vmatpush3.msra.mxu1 %v64_v48  ;;  %897 = vmatpush3.msra.mxu0 %v31_v49 }
  0x1c   :  { %931 = vmatprep.subr.mxu1 %v79_v50  ;;  %898 = vmatprep.subr.mxu0 %v46_v51 }
  0x1d   :  { %932 = vmatpush3.msra.mxu1 %v63_v52  ;;  %899 = vmatpush3.msra.mxu0 %v30_v53 }
  0x1e   :  { %933 = vmatprep.subr.mxu1 %v78_v54  ;;  %900 = vmatprep.subr.mxu0 %v45_v55 }
  0x1f   :  { %934 = vmatpush3.msra.mxu1 %v62_v56  ;;  %901 = vmatpush3.msra.mxu0 %v29_v57 }
  0x20   :  { %935 = vmatprep.subr.mxu1 %v77_v58  ;;  %902 = vmatprep.subr.mxu0 %v44_v59 }
  0x21   :  { %201 = vmatprep.mubr.f32.mxu0 %v22_v60  ;;  %903 = vmatpush3.msra.mxu0 %v28_v61 }
  0x22   :  { %936 = vmatpush3.msra.mxu1 %v61_v62  ;;  %202 = vmatmul.mubr.f32.vlgmr.msra.gmra.mxu0 %v21_v63 }
  0x23   :  { %937 = vmatprep.subr.mxu1 %v76_v0  ;;  %942 = vmatprep.subr.mxu0 %v123_v1 }
  0x24   :  { %938 = vmatpush3.msra.mxu1 %v60_v2  ;;  %271 = vmatprep.mubr.f32.mxu1 %v24_v3 }
  0x25   :  { %943 = vmatpush3.msra.mxu0 %v107_v4 }
  0x26   :  { %10 = vsyncpa [#allocation3], 0  ;;  %272 = vmatmul.mubr.f32.vlgmr.msra.gmra.mxu1 %v23_v5  ;;  %944 = vmatprep.subr.mxu0 %v122_v6  ;;  %v105_v10 = vld [vmem:[%s1791_s1 + $0x268] sm:$0xff]  ;;  %v120_v12 = vld [vmem:[%s1791_s1 + $0x2e0] sm:$0xff]  ;;  %v1064_v14 = vmov 0.0   ;;  %vm133_vm0 = vcmask 130048  }
  0x27   :  { %v125_v11 = vld [vmem:[%s1791_s1 + $0x308] sm:$0xff]  ;;  %945 = vmatpush3.msra.mxu0 %v106_v7  ;;  %341 = vmatprep.mubr.f32.mxu0 %v26_v8  ;;  %v104_v13 = vld [vmem:[%s1791_s1 + $0x260] sm:$0xff]  ;;  %v119_v16 = vld [vmem:[%s1791_s1 + $0x2d8] sm:$0xff]  ;;  %vm1065_vm1 = vmmov 0  }
  0x28   :  { %946 = vmatprep.subr.mxu0 %v121_v9  ;;  %997 = vmatprep.subr.mxu1 %v1064_v14  ;;  %v124_v15 = vld [vmem:[%s1791_s1 + $0x300] sm:$0xff]  ;;  %v103_v17 = vld [vmem:[%s1791_s1 + $0x258] sm:$0xff]  ;;  %v27_v18 = vld [vmem:[%s1790_s0 + $0x30] sm:$0xff] }
  0x29   :  { %947 = vmatpush3.msra.mxu0 %v105_v10  ;;  %998 = vmatpush3.msra.mxu1 %v125_v11  ;;  %v118_v19 = vld [vmem:[%s1791_s1 + $0x2d0] sm:$0xff]  ;;  %v117_v21 = vld [vmem:[%s1791_s1 + $0x2c8] sm:$0xff]  ;;  %v116_v23 = vld [vmem:[%s1791_s1 + $0x2c0] sm:$0xff] }
  0x2a   :  { %948 = vmatprep.subr.mxu0 %v120_v12  ;;  %999 = vmatprep.subr.mxu1 %v1064_v14  ;;  %v102_v20 = vld [vmem:[%s1791_s1 + $0x250] sm:$0xff]  ;;  %v101_v22 = vld [vmem:[%s1791_s1 + $0x248] sm:$0xff]  ;;  %v100_v24 = vld [vmem:[%s1791_s1 + $0x240] sm:$0xff] }
  0x2b   :  { %949 = vmatpush3.msra.mxu0 %v104_v13  ;;  %1000 = vmatpush3.msra.mxu1 %v124_v15  ;;  %v115_v25 = vld [vmem:[%s1791_s1 + $0x2b8] sm:$0xff]  ;;  %v114_v27 = vld [vmem:[%s1791_s1 + $0x2b0] sm:$0xff]  ;;  %v113_v29 = vld [vmem:[%s1791_s1 + $0x2a8] sm:$0xff] }
  0x2c   :  { %950 = vmatprep.subr.mxu0 %v119_v16  ;;  %1001 = vmatprep.mubr.msk.f32.mxu1 %vm1065_vm1, %v1064_v14  ;;  %v99_v26 = vld [vmem:[%s1791_s1 + $0x238] sm:$0xff]  ;;  %v98_v28 = vld [vmem:[%s1791_s1 + $0x230] sm:$0xff]  ;;  %v97_v30 = vld [vmem:[%s1791_s1 + $0x228] sm:$0xff] }
  0x2d   :  { %951 = vmatpush3.msra.mxu0 %v103_v17  ;;  %1002 = vmatmul.mubr.msk.f32.vlgmr.msra.gmra.mxu1 %vm133_vm0, %v27_v18  ;;  %v112_v31 = vld [vmem:[%s1791_s1 + $0x2a0] sm:$0xff]  ;;  %v111_v33 = vld [vmem:[%s1791_s1 + $0x298] sm:$0xff]  ;;  %v110_v35 = vld [vmem:[%s1791_s1 + $0x290] sm:$0xff] }
  0x2e   :  { %952 = vmatprep.subr.mxu0 %v118_v19  ;;  %630 = vmatprep.mubr.f32.mxu1 %v1064_v14  ;;  %v96_v32 = vld [vmem:[%s1791_s1 + $0x220] sm:$0xff]  ;;  %v95_v34 = vld [vmem:[%s1791_s1 + $0x218] sm:$0xff]  ;;  %v94_v36 = vld [vmem:[%s1791_s1 + $0x210] sm:$0xff] }
  0x2f   :  { %953 = vmatpush3.msra.mxu0 %v102_v20  ;;  %v109_v37 = vld [vmem:[%s1791_s1 + $0x288] sm:$0xff]  ;;  %v108_v39 = vld [vmem:[%s1791_s1 + $0x280] sm:$0xff]  ;;  %v523_v42 = vld [vmem:[%s1793_s3 + $0x350] sm:$0xff] }
  0x30   :  { %954 = vmatprep.subr.mxu0 %v117_v21  ;;  %v93_v38 = vld [vmem:[%s1791_s1 + $0x208] sm:$0xff]  ;;  %v92_v40 = vld [vmem:[%s1791_s1 + $0x200] sm:$0xff]  ;;  %566 = vmatprep.subr.mxu1 %v523_v42  ;;  %v524_v45 = vld [vmem:[%s1793_s3 + $0x358] sm:$0xff] }
  0x31   :  { %955 = vmatpush3.msra.mxu0 %v101_v22  ;;  %v25_v41 = vld [vmem:[%s1790_s0 + $0x20] sm:$0xff]  ;;  %v522_v44 = vld [vmem:[%s1793_s3 + $0x348] sm:$0xff]  ;;  %v516_v46 = vld [vmem:[%s1793_s3 + $0x318] sm:$0xff] }
  0x32   :  { %956 = vmatprep.subr.mxu0 %v116_v23  ;;  %v525_v43 = vld [vmem:[%s1793_s3 + $0x360] sm:$0xff]  ;;  %v518_v47 = vld [vmem:[%s1793_s3 + $0x328] sm:$0xff]  ;;  %567 = vmatpush1.msra.mxu1 %v522_v44  ;;  %v515_v48 = vld [vmem:[%s1793_s3 + $0x310] sm:$0xff] }
  0x33   :  { %957 = vmatpush3.msra.mxu0 %v100_v24  ;;  %v517_v49 = vld [vmem:[%s1793_s3 + $0x320] sm:$0xff]  ;;  %568 = vmatprep.subr.mxu1 %v516_v46  ;;  %v511_v51 = vld [vmem:[%s1793_s3 + $0x2f0] sm:$0xff]  ;;  %v508_v52 = vld [vmem:[%s1793_s3 + $0x2d8] sm:$0xff] }
  0x34   :  { %958 = vmatprep.subr.mxu0 %v115_v25  ;;  %v509_v50 = vld [vmem:[%s1793_s3 + $0x2e0] sm:$0xff]  ;;  %v510_v53 = vld [vmem:[%s1793_s3 + $0x2e8] sm:$0xff]  ;;  %569 = vmatpush1.msra.mxu1 %v515_v48  ;;  %v504_v55 = vld [vmem:[%s1793_s3 + $0x2b8] sm:$0xff] }
  0x35   :  { %959 = vmatpush3.msra.mxu0 %v99_v26  ;;  %v502_v54 = vld [vmem:[%s1793_s3 + $0x2a8] sm:$0xff]  ;;  %570 = vmatprep.subr.mxu1 %v509_v50  ;;  %v501_v56 = vld [vmem:[%s1793_s3 + $0x2a0] sm:$0xff]  ;;  %v503_v57 = vld [vmem:[%s1793_s3 + $0x2b0] sm:$0xff] }
  0x36   :  { %960 = vmatprep.subr.mxu0 %v114_v27  ;;  %571 = vmatpush1.msra.mxu1 %v508_v52  ;;  %v495_v58 = vld [vmem:[%s1793_s3 + $0x270] sm:$0xff]  ;;  %v497_v59 = vld [vmem:[%s1793_s3 + $0x280] sm:$0xff]  ;;  %v494_v60 = vld [vmem:[%s1793_s3 + $0x268] sm:$0xff] }
  0x37   :  { %961 = vmatpush3.msra.mxu0 %v98_v28  ;;  %572 = vmatprep.subr.mxu1 %v502_v54  ;;  %v496_v61 = vld [vmem:[%s1793_s3 + $0x278] sm:$0xff]  ;;  %v490_v63 = vld [vmem:[%s1793_s3 + $0x248] sm:$0xff]  ;;  %v487_v0 = vld [vmem:[%s1793_s3 + $0x230] sm:$0xff] }
  0x38   :  { %962 = vmatprep.subr.mxu0 %v113_v29  ;;  %573 = vmatpush1.msra.mxu1 %v501_v56  ;;  %v488_v62 = vld [vmem:[%s1793_s3 + $0x238] sm:$0xff]  ;;  %v489_v1 = vld [vmem:[%s1793_s3 + $0x240] sm:$0xff]  ;;  %v483_v3 = vld [vmem:[%s1793_s3 + $0x210] sm:$0xff] }
  0x39   :  { %963 = vmatpush3.msra.mxu0 %v97_v30  ;;  %574 = vmatprep.subr.mxu1 %v495_v58  ;;  %v481_v2 = vld [vmem:[%s1793_s3 + $0x200] sm:$0xff]  ;;  %v480_v4 = vld [vmem:[%s1793_s3 + $0x1f8] sm:$0xff]  ;;  %v482_v5 = vld [vmem:[%s1793_s3 + $0x208] sm:$0xff] }
  0x3a   :  { %964 = vmatprep.subr.mxu0 %v112_v31  ;;  %575 = vmatpush1.msra.mxu1 %v494_v60  ;;  %v474_v6 = vld [vmem:[%s1793_s3 + $0x1c8] sm:$0xff]  ;;  %v476_v7 = vld [vmem:[%s1793_s3 + $0x1d8] sm:$0xff]  ;;  %v473_v8 = vld [vmem:[%s1793_s3 + $0x1c0] sm:$0xff] }
  0x3b   :  { %965 = vmatpush3.msra.mxu0 %v96_v32  ;;  %576 = vmatprep.subr.mxu1 %v488_v62  ;;  %v475_v9 = vld [vmem:[%s1793_s3 + $0x1d0] sm:$0xff]  ;;  %v469_v11 = vld [vmem:[%s1793_s3 + $0x1a0] sm:$0xff]  ;;  %v466_v12 = vld [vmem:[%s1793_s3 + $0x188] sm:$0xff] }
  0x3c   :  { %966 = vmatprep.subr.mxu0 %v111_v33  ;;  %577 = vmatpush1.msra.mxu1 %v487_v0  ;;  %v467_v10 = vld [vmem:[%s1793_s3 + $0x190] sm:$0xff]  ;;  %v468_v13 = vld [vmem:[%s1793_s3 + $0x198] sm:$0xff]  ;;  %v462_v16 = vld [vmem:[%s1793_s3 + $0x168] sm:$0xff] }
  0x3d   :  { %967 = vmatpush3.msra.mxu0 %v95_v34  ;;  %578 = vmatprep.subr.mxu1 %v481_v2  ;;  %v460_v15 = vld [vmem:[%s1793_s3 + $0x158] sm:$0xff]  ;;  %v459_v17 = vld [vmem:[%s1793_s3 + $0x150] sm:$0xff]  ;;  %v461_v18 = vld [vmem:[%s1793_s3 + $0x160] sm:$0xff] }
  0x3e   :  { %968 = vmatprep.subr.mxu0 %v110_v35  ;;  %579 = vmatpush1.msra.mxu1 %v480_v4  ;;  %v453_v19 = vld [vmem:[%s1793_s3 + $0x120] sm:$0xff]  ;;  %v455_v20 = vld [vmem:[%s1793_s3 + $0x130] sm:$0xff]  ;;  %v452_v21 = vld [vmem:[%s1793_s3 + $0x118] sm:$0xff] }
  0x3f   :  { %969 = vmatpush3.msra.mxu0 %v94_v36  ;;  %580 = vmatprep.subr.mxu1 %v474_v6  ;;  %v454_v22 = vld [vmem:[%s1793_s3 + $0x128] sm:$0xff]  ;;  %v448_v24 = vld [vmem:[%s1793_s3 + $0xf8] sm:$0xff]  ;;  %v445_v25 = vld [vmem:[%s1793_s3 + $0xe0] sm:$0xff] }
  0x40   :  { %970 = vmatprep.subr.mxu0 %v109_v37  ;;  %581 = vmatpush1.msra.mxu1 %v473_v8  ;;  %v446_v23 = vld [vmem:[%s1793_s3 + $0xe8] sm:$0xff]  ;;  %v447_v26 = vld [vmem:[%s1793_s3 + $0xf0] sm:$0xff]  ;;  %v441_v28 = vld [vmem:[%s1793_s3 + $0xc0] sm:$0xff] }
  0x41   :  { %971 = vmatpush3.msra.mxu0 %v93_v38  ;;  %582 = vmatprep.subr.mxu1 %v467_v10  ;;  %v439_v27 = vld [vmem:[%s1793_s3 + $0xb0] sm:$0xff]  ;;  %v438_v29 = vld [vmem:[%s1793_s3 + $0xa8] sm:$0xff]  ;;  %v440_v30 = vld [vmem:[%s1793_s3 + $0xb8] sm:$0xff] }
  0x42   :  { %972 = vmatprep.subr.mxu0 %v108_v39  ;;  %583 = vmatpush1.msra.mxu1 %v466_v12  ;;  %v432_v31 = vld [vmem:[%s1793_s3 + $0x78] sm:$0xff]  ;;  %v434_v32 = vld [vmem:[%s1793_s3 + $0x88] sm:$0xff]  ;;  %v431_v33 = vld [vmem:[%s1793_s3 + $0x70] sm:$0xff] }
  0x43   :  { %973 = vmatpush3.msra.mxu0 %v92_v40  ;;  %584 = vmatprep.subr.mxu1 %v460_v15  ;;  %v433_v34 = vld [vmem:[%s1793_s3 + $0x80] sm:$0xff]  ;;  %v427_v36 = vld [vmem:[%s1793_s3 + $0x50] sm:$0xff]  ;;  %v424_v37 = vld [vmem:[%s1793_s3 + $0x38] sm:$0xff] }
  0x44   :  { %342 = vmatmul.mubr.f32.vlgmr.msra.gmra.mxu0 %v25_v41  ;;  %637 = vmatprep.subr.mxu0 %v525_v43  ;;  %v425_v35 = vld [vmem:[%s1793_s3 + $0x40] sm:$0xff]  ;;  %v426_v38 = vld [vmem:[%s1793_s3 + $0x48] sm:$0xff]  ;;  %v420_v40 = vld [vmem:[%s1793_s3 + $0x18] sm:$0xff] }
  0x45   :  { %701 = vmatprep.mubr.f32.mxu0 %v1064_v14  ;;  %638 = vmatpush1.msra.mxu0 %v524_v45  ;;  %v418_v39 = vld [vmem:[%s1793_s3 + $0x8] sm:$0xff]  ;;  %v417_v41 = vld [vmem:[%s1793_s3] sm:$0xff]  ;;  %v419_v42 = vld [vmem:[%s1793_s3 + $0x10] sm:$0xff] }
  0x46   :  { %639 = vmatprep.subr.mxu0 %v518_v47  ;;  %585 = vmatpush1.msra.mxu1 %v459_v17  ;;  %v527_v43 = vld [vmem:[%s1793_s3 + $0x370] sm:$0xff]  ;;  %v526_v60 = vld [vmem:[%s1793_s3 + $0x368] sm:$0xff]  ;;  %v520_v62 = vld [vmem:[%s1793_s3 + $0x338] sm:$0xff] }
  0x47   :  { %640 = vmatpush1.msra.mxu0 %v517_v49  ;;  %586 = vmatprep.subr.mxu1 %v453_v19  ;;  %v521_v0 = vld [vmem:[%s1793_s3 + $0x340] sm:$0xff]  ;;  %v512_v2 = vld [vmem:[%s1793_s3 + $0x2f8] sm:$0xff]  ;;  %v506_v4 = vld [vmem:[%s1793_s3 + $0x2c8] sm:$0xff] }
  0x48   :  { %641 = vmatprep.subr.mxu0 %v511_v51  ;;  %587 = vmatpush1.msra.mxu1 %v452_v21  ;;  %v870_v51 = vld [vmem:[%s1792_s2] ss:$0 sm:$0xff]  ;;  %v507_v6 = vld [vmem:[%s1793_s3 + $0x2d0] sm:$0xff]  ;;  %v498_v8 = vld [vmem:[%s1793_s3 + $0x288] sm:$0xff] }
  0x49   :  { %642 = vmatpush1.msra.mxu0 %v510_v53  ;;  %588 = vmatprep.subr.mxu1 %v446_v23  ;;  %v492_v10 = vld [vmem:[%s1793_s3 + $0x258] sm:$0xff]  ;;  %v493_v12 = vld [vmem:[%s1793_s3 + $0x260] sm:$0xff]  ;;  %v478_v17 = vld [vmem:[%s1793_s3 + $0x1e8] sm:$0xff] }
  0x4a   :  { %643 = vmatprep.subr.mxu0 %v504_v55  ;;  %589 = vmatpush1.msra.mxu1 %v445_v25  ;;  %v484_v15 = vld [vmem:[%s1793_s3 + $0x218] sm:$0xff]  ;;  %v479_v19 = vld [vmem:[%s1793_s3 + $0x1f0] sm:$0xff]  ;;  %v470_v21 = vld [vmem:[%s1793_s3 + $0x1a8] sm:$0xff] }
  0x4b   :  { %644 = vmatpush1.msra.mxu0 %v503_v57  ;;  %590 = vmatprep.subr.mxu1 %v439_v27  ;;  %v464_v23 = vld [vmem:[%s1793_s3 + $0x178] sm:$0xff]  ;;  %v465_v25 = vld [vmem:[%s1793_s3 + $0x180] sm:$0xff] }
  0x4c   :  { %645 = vmatprep.subr.mxu0 %v497_v59  ;;  %591 = vmatpush1.msra.mxu1 %v438_v29  ;;  %v456_v27 = vld [vmem:[%s1793_s3 + $0x138] sm:$0xff]  ;;  %v450_v29 = vld [vmem:[%s1793_s3 + $0x108] sm:$0xff] }
  0x4d   :  { %646 = vmatpush1.msra.mxu0 %v496_v61  ;;  %592 = vmatprep.subr.mxu1 %v432_v31  ;;  %v528_v61 = vld [vmem:[%s1793_s3 + $0x378] sm:$0xff]  ;;  %v451_v31 = vld [vmem:[%s1793_s3 + $0x110] sm:$0xff] }
  0x4e   :  { %647 = vmatprep.subr.mxu0 %v490_v63  ;;  %593 = vmatpush1.msra.mxu1 %v431_v33  ;;  %v519_v63 = vld [vmem:[%s1793_s3 + $0x330] sm:$0xff]  ;;  %v442_v33 = vld [vmem:[%s1793_s3 + $0xc8] sm:$0xff] }
  0x4f   :  { %648 = vmatpush1.msra.mxu0 %v489_v1  ;;  %594 = vmatprep.subr.mxu1 %v425_v35  ;;  %v513_v1 = vld [vmem:[%s1793_s3 + $0x300] sm:$0xff]  ;;  %v436_v35 = vld [vmem:[%s1793_s3 + $0x98] sm:$0xff] }
  0x50   :  { %649 = vmatprep.subr.mxu0 %v483_v3  ;;  %595 = vmatpush1.msra.mxu1 %v424_v37  ;;  %v514_v3 = vld [vmem:[%s1793_s3 + $0x308] sm:$0xff]  ;;  %v437_v37 = vld [vmem:[%s1793_s3 + $0xa0] sm:$0xff] }
  0x51   :  { %650 = vmatpush1.msra.mxu0 %v482_v5  ;;  %596 = vmatprep.subr.mxu1 %v418_v39  ;;  %v505_v5 = vld [vmem:[%s1793_s3 + $0x2c0] sm:$0xff]  ;;  %v428_v39 = vld [vmem:[%s1793_s3 + $0x58] sm:$0xff] }
  0x52   :  { %651 = vmatprep.subr.mxu0 %v476_v7  ;;  %597 = vmatpush1.msra.mxu1 %v417_v41  ;;  %v499_v7 = vld [vmem:[%s1793_s3 + $0x290] sm:$0xff]  ;;  %v422_v41 = vld [vmem:[%s1793_s3 + $0x28] sm:$0xff] }
  0x53   :  { %652 = vmatpush1.msra.mxu0 %v475_v9  ;;  %708 = vmatprep.subr.mxu1 %v527_v43  ;;  %v500_v9 = vld [vmem:[%s1793_s3 + $0x298] sm:$0xff]  ;;  %v423_v43 = vld [vmem:[%s1793_s3 + $0x30] sm:$0xff] }
  0x54   :  { %653 = vmatprep.subr.mxu0 %v469_v11  ;;  %v491_v11 = vld [vmem:[%s1793_s3 + $0x250] sm:$0xff] }
  0x55   :  { %654 = vmatpush1.msra.mxu0 %v468_v13  ;;  %v485_v13 = vld [vmem:[%s1793_s3 + $0x220] sm:$0xff] }
  0x56   :  { %655 = vmatprep.subr.mxu0 %v462_v16  ;;  %v486_v16 = vld [vmem:[%s1793_s3 + $0x228] sm:$0xff] }
  0x57   :  { %656 = vmatpush1.msra.mxu0 %v461_v18  ;;  %v477_v18 = vld [vmem:[%s1793_s3 + $0x1e0] sm:$0xff] }
  0x58   :  { %657 = vmatprep.subr.mxu0 %v455_v20  ;;  %v471_v20 = vld [vmem:[%s1793_s3 + $0x1b0] sm:$0xff] }
  0x59   :  { %658 = vmatpush1.msra.mxu0 %v454_v22  ;;  %v472_v22 = vld [vmem:[%s1793_s3 + $0x1b8] sm:$0xff] }
  0x5a   :  { %659 = vmatprep.subr.mxu0 %v448_v24  ;;  %v463_v24 = vld [vmem:[%s1793_s3 + $0x170] sm:$0xff] }
  0x5b   :  { %660 = vmatpush1.msra.mxu0 %v447_v26  ;;  %v457_v26 = vld [vmem:[%s1793_s3 + $0x140] sm:$0xff] }
  0x5c   :  { %661 = vmatprep.subr.mxu0 %v441_v28  ;;  %v458_v28 = vld [vmem:[%s1793_s3 + $0x148] sm:$0xff] }
  0x5d   :  { %662 = vmatpush1.msra.mxu0 %v440_v30  ;;  %v449_v30 = vld [vmem:[%s1793_s3 + $0x100] sm:$0xff] }
  0x5e   :  { %663 = vmatprep.subr.mxu0 %v434_v32  ;;  %v443_v32 = vld [vmem:[%s1793_s3 + $0xd0] sm:$0xff] }
  0x5f   :  { %664 = vmatpush1.msra.mxu0 %v433_v34  ;;  %v444_v34 = vld [vmem:[%s1793_s3 + $0xd8] sm:$0xff] }
  0x60   :  { %665 = vmatprep.subr.mxu0 %v427_v36  ;;  %v435_v36 = vld [vmem:[%s1793_s3 + $0x90] sm:$0xff] }
  0x61   :  { %666 = vmatpush1.msra.mxu0 %v426_v38  ;;  %v429_v38 = vld [vmem:[%s1793_s3 + $0x60] sm:$0xff] }
  0x62   :  { %667 = vmatprep.subr.mxu0 %v420_v40  ;;  %v430_v40 = vld [vmem:[%s1793_s3 + $0x68] sm:$0xff] }
  0x63   :  { %668 = vmatpush1.msra.mxu0 %v419_v42  ;;  %v421_v42 = vld [vmem:[%s1793_s3 + $0x20] sm:$0xff] }
  0x64   :  { %1004 = vmatprep.subr.mxu0 %v1064_v14 }
  0xe2   :  { %v904_v48 = vpop.f32.mrf.mxu0 }
  0xe4   :  { %v905_v49 = vpop.f32.mrf.mxu0 }
  0xe5   :  { %v906_v50 = vadd.f32 %v905_v49, %v904_v48  ;;  %v529_v48 = vld [vmem:[%s1794_s4] sm:$0x7f]  ;;  %s1066_s4 = smov [#allocation2]  }
  0xe6   :  { %v939_v44 = vpop.f32.mrf.mxu1  ;;  %s862_s8 = sshll.u32 %s1066_s4, 4  ;;  %s863_s8 = int_to_ptr.vmem [resolvable:$true] %s862_s8 }
  0xe7   :  { %v204_v52 = vadd.f32 %v906_v50, %v870_v51  ;;  %s1042_s9 = scalar_lea.vmem %s863_s8, 896  ;;  %p1047_p1 = scmp.lt.s32.totalorder %s863_s8, %s863_s8 }
  0xe8   :  { %v940_v45 = vpop.f32.mrf.mxu1  ;;  %p1043_p0 = scmp.ne.s32.totalorder %s863_s8, %s1042_s9  ;;  %p1048_p2 = scmp.lt.s32.totalorder %s1042_s9, %s1042_s9 }
  0xe9   :  { %v941_v53 = vadd.f32 %v940_v45, %v939_v44  ;;  %v531_v44 = vlaneseq }
  0xea   :  { %p1049_p3 = por %p1048_p2, %p1047_p1 }
  0xeb   :  { %v274_v56 = vadd.f32 %v941_v53, %v204_v52  ;;  %v532_v45 = vshrl.u32 %v531_v44, 7 }
  0xec   :  { %p1050_p4 = pnand %p1049_p3, %p1043_p0 }
  0xed   :  { %v413_v46 = vpop.f32.mrf.mxu1  ;;  %v537_v49 = vsub.s32 1, %v532_v45  ;;  %v545_v50 = vsub.s32 3, %v532_v45 }
  0xef   :  { %v1003_v47 = vpop.f32.mrf.mxu1  ;;  %v538_v53 = vrot.slane %v529_v48, %v537_v49 }
  0xf0   :  { %v541_v47 = vsub.s32 2, %v532_v45 }
  0xf2   :  { %v542_v52 = vrot.slane %v529_v48, %v541_v47 }
 0x104   :  { %v974_v54 = vpop.f32.mrf.mxu0 }
 0x106   :  { %v975_v55 = vpop.f32.mrf.mxu0 }
 0x107   :  { %v976_v57 = vadd.f32 %v975_v55, %v974_v54  ;;  %v546_v54 = vrot.slane %v529_v48, %v545_v50 }
 0x109   :  { %v344_v58 = vadd.f32 %v976_v57, %v274_v56 }
 0x10b   :  { %v1618_v59 = vadd.f32 %v413_v46, %v344_v58  ;;  %v533_v46 = vsub.s32 0, %v532_v45 }
 0x10d   :  { %631 = vmatmul.mubr.f32.vlgmr.msra.gmra.mxu1 %v1618_v59  ;;  %702 = vmatmul.mubr.f32.vlgmr.msra.gmra.mxu0 %v1618_v59  ;;  %v534_v51 = vrot.slane %v529_v48, %v533_v46 }
 0x10e   :  { %709 = vmatpush1.msra.mxu1 %v526_v60  ;;  %1005 = vmatpush3.msra.mxu0 %v528_v61 }
 0x10f   :  { %710 = vmatprep.subr.mxu1 %v520_v62  ;;  %1006 = vmatprep.subr.mxu0 %v1064_v14  ;;  %v549_v62 = vsub.s32 4, %v532_v45 }
 0x110   :  { %711 = vmatpush1.msra.mxu1 %v519_v63  ;;  %1007 = vmatpush3.msra.mxu0 %v521_v0  ;;  %v557_v63 = vsub.s32 6, %v532_v45  ;;  %v553_v0 = vsub.s32 5, %v532_v45 }
 0x111   :  { %712 = vmatprep.subr.mxu1 %v513_v1  ;;  %1008 = vmatprep.subr.mxu0 %v1064_v14  ;;  %v550_v1 = vrot.slane %v529_v48, %v549_v62 }
 0x112   :  { %713 = vmatpush1.msra.mxu1 %v512_v2  ;;  %1009 = vmatpush3.msra.mxu0 %v514_v3  ;;  %v558_v2 = vrot.slane %v529_v48, %v557_v63  ;;  %v554_v3 = vrot.slane %v529_v48, %v553_v0 }
 0x113   :  { %714 = vmatprep.subr.mxu1 %v506_v4  ;;  %1010 = vmatprep.subr.mxu0 %v1064_v14 }
 0x114   :  { %715 = vmatpush1.msra.mxu1 %v505_v5  ;;  %1011 = vmatpush3.msra.mxu0 %v507_v6 }
 0x115   :  { %716 = vmatprep.subr.mxu1 %v499_v7  ;;  %1012 = vmatprep.subr.mxu0 %v1064_v14 }
 0x116   :  { %717 = vmatpush1.msra.mxu1 %v498_v8  ;;  %1013 = vmatpush3.msra.mxu0 %v500_v9 }
 0x117   :  { %718 = vmatprep.subr.mxu1 %v492_v10  ;;  %1014 = vmatprep.subr.mxu0 %v1064_v14 }
 0x118   :  { %719 = vmatpush1.msra.mxu1 %v491_v11  ;;  %1015 = vmatpush3.msra.mxu0 %v493_v12 }
 0x119   :  { %720 = vmatprep.subr.mxu1 %v485_v13  ;;  %1016 = vmatprep.subr.mxu0 %v1064_v14 }
 0x11a   :  { %721 = vmatpush1.msra.mxu1 %v484_v15  ;;  %1017 = vmatpush3.msra.mxu0 %v486_v16 }
 0x11b   :  { %722 = vmatprep.subr.mxu1 %v478_v17  ;;  %1018 = vmatprep.subr.mxu0 %v1064_v14 }
 0x11c   :  { %723 = vmatpush1.msra.mxu1 %v477_v18  ;;  %1019 = vmatpush3.msra.mxu0 %v479_v19 }
 0x11d   :  { %724 = vmatprep.subr.mxu1 %v471_v20  ;;  %1020 = vmatprep.subr.mxu0 %v1064_v14 }
 0x11e   :  { %725 = vmatpush1.msra.mxu1 %v470_v21  ;;  %1021 = vmatpush3.msra.mxu0 %v472_v22 }
 0x11f   :  { %726 = vmatprep.subr.mxu1 %v464_v23  ;;  %1022 = vmatprep.subr.mxu0 %v1064_v14 }
 0x120   :  { %727 = vmatpush1.msra.mxu1 %v463_v24  ;;  %1023 = vmatpush3.msra.mxu0 %v465_v25 }
 0x121   :  { %728 = vmatprep.subr.mxu1 %v457_v26  ;;  %1024 = vmatprep.subr.mxu0 %v1064_v14 }
 0x122   :  { %729 = vmatpush1.msra.mxu1 %v456_v27  ;;  %1025 = vmatpush3.msra.mxu0 %v458_v28 }
 0x123   :  { %730 = vmatprep.subr.mxu1 %v450_v29  ;;  %1026 = vmatprep.subr.mxu0 %v1064_v14 }
 0x124   :  { %731 = vmatpush1.msra.mxu1 %v449_v30  ;;  %1027 = vmatpush3.msra.mxu0 %v451_v31 }
 0x125   :  { %732 = vmatprep.subr.mxu1 %v443_v32  ;;  %1028 = vmatprep.subr.mxu0 %v1064_v14 }
 0x126   :  { %733 = vmatpush1.msra.mxu1 %v442_v33  ;;  %1029 = vmatpush3.msra.mxu0 %v444_v34 }
 0x127   :  { %734 = vmatprep.subr.mxu1 %v436_v35  ;;  %1030 = vmatprep.subr.mxu0 %v1064_v14 }
 0x128   :  { %735 = vmatpush1.msra.mxu1 %v435_v36  ;;  %1031 = vmatpush3.msra.mxu0 %v437_v37 }
 0x129   :  { %736 = vmatprep.subr.mxu1 %v429_v38  ;;  %1032 = vmatprep.subr.mxu0 %v1064_v14 }
 0x12a   :  { %737 = vmatpush1.msra.mxu1 %v428_v39  ;;  %1033 = vmatpush3.msra.mxu0 %v430_v40 }
 0x12b   :  { %738 = vmatprep.subr.mxu1 %v422_v41  ;;  %1034 = vmatprep.subr.mxu0 %v1064_v14 }
 0x12c   :  { %739 = vmatpush1.msra.mxu1 %v421_v42  ;;  %772 = vmatprep.mubr.f32.mxu1 %v1064_v14 }
 0x12d   :  { %1035 = vmatpush3.msra.mxu0 %v423_v43  ;;  %1036 = vmatprep.mubr.msk.f32.mxu0 %vm1065_vm1, %v1064_v14 }
 0x12e   :  { %773 = vmatmul.mubr.f32.vlgmr.msra.gmra.mxu1 %v1618_v59  ;;  %1037 = vmatmul.mubr.f32.vlgmr.msra.gmra.mxu0 %v1618_v59 }
 0x1cd   :  { %v632_v55 = vpop.f32.mrf.mxu1  ;;  %v703_v14 = vpop.f32.mrf.mxu0 }
 0x1ce   :  { %v633_v56 = vadd.f32 %v632_v55, %v534_v51  ;;  %v704_v57 = vadd.f32 %v703_v14, %v542_v52 }
 0x1cf   :  { %v634_v58 = vpop.f32.mrf.mxu1  ;;  %v705_v59 = vpop.f32.mrf.mxu0 }
 0x1d0   :  { %849 = vst [vmem:[#allocation2] sm:$0xff] %v633_v56  ;;  %851 = vst [vmem:[#allocation2 + $0x10] sm:$0xff] %v704_v57  ;;  %v635_v60 = vadd.f32 %v634_v58, %v538_v53  ;;  %v706_v61 = vadd.f32 %v705_v59, %v546_v54 }
 0x1d2   :  { %850 = vst [vmem:[#allocation2 + $0x8] sm:$0xff] %v635_v60  ;;  %852 = vst [vmem:[#allocation2 + $0x18] sm:$0xff] %v706_v61 }
 0x1ee   :  { %v774_v4 = vpop.f32.mrf.mxu1  ;;  %v845_v5 = vpop.f32.mrf.mxu0 }
 0x1ef   :  { %v775_v6 = vadd.f32 %v774_v4, %v550_v1  ;;  %v846_v7 = vadd.f32 %v845_v5, %v558_v2 }
 0x1f0   :  { %v776_v8 = vpop.f32.mrf.mxu1  ;;  %v1038_v9 = vpop.f32.mrf.mxu0 }
 0x1f1   :  { %853 = vst [vmem:[#allocation2 + $0x20] sm:$0xff] %v775_v6  ;;  %855 = vst.msk [vmem:[#allocation2 + $0x30] sm:$0xff] %vm133_vm0, %v846_v7  ;;  %v777_v10 = vadd.f32 %v776_v8, %v554_v3 }
 0x1f3   :  { %854 = vst [vmem:[#allocation2 + $0x28] sm:$0xff] %v777_v10 }
 0x1f4   :  { %1053 = shalt.err (!%p1050_p4)
}
 0x1f5   :  { %865 = dma.vmem_to_hbm [thread:$0]  %s863_s8, 896, %s1795_s5, [#allocation3]  }
 0x1f6   :  { %1062 = dma.done.wait [#allocation3], 896  }
 0x1f7   :  { %1063 = vsyncadd [#allocation3], 4294966400 }
 0x1f8   :  { %869 = vsyncpa [#allocation3], 1 }

</bundles_post_ra>
